<compile_context>
chip_gen: v6e
topology: v6e:2x2x1
jax: 0.10.0
libtpu: 0.0.40
codegen_flags: <defaults>
</compile_context>

<pallas_src>
import functools

import numpy as np
import jax
import jax.numpy as jnp
from jax.experimental import pallas as pl
from jax.experimental.pallas import tpu as pltpu


# ----------------------------- hardware-aware config -----------------------------

def _round_up(v, m):
    return (v + m - 1) // m * m


def _tpu_vmem_capacity():
    try:
        info = pltpu.get_tpu_info()
        cap = getattr(info, "vmem_capacity_bytes", None)
        if cap:
            return int(cap)
    except Exception:
        pass
    return 64 * 1024 * 1024  # conservative (v7x-sized) fallback


_VMEM_CAP = _tpu_vmem_capacity()
if _VMEM_CAP >= 96 * 1024 * 1024:       # v5e / v6e: 128 MiB VMEM
    _VMEM_LIMIT = 80 * 1024 * 1024
    _TM_CAP = 1024
else:                                    # v7x: 64 MiB per TensorCore (or unknown)
    _VMEM_LIMIT = 44 * 1024 * 1024
    _TM_CAP = 512


# ----------------------------- Pallas kernels -----------------------------

def _matmul_bn_kernel(x_ref, w_ref, b_ref, o_ref, *, relu):
    y = jnp.dot(x_ref[...], w_ref[...], preferred_element_type=jnp.float32)
    y = y + b_ref[...]
    if relu:
        y = jnp.maximum(y, 0.0)
    o_ref[...] = y.astype(o_ref.dtype)


def _matmul_bn_res_kernel(x_ref, w_ref, b_ref, r_ref, o_ref, *, relu):
    y = jnp.dot(x_ref[...], w_ref[...], preferred_element_type=jnp.float32)
    y = y + b_ref[...] + r_ref[...].astype(jnp.float32)
    if relu:
        y = jnp.maximum(y, 0.0)
    o_ref[...] = y.astype(o_ref.dtype)


def _maxpool_kernel(r0_ref, r1_ref, r2_ref, o_ref):
    # vertical 3-way max of the three fetched rows, then horizontal 3-wide max
    # via static in-VMEM column shifts (output still at input column stride; the
    # cheap stride-2 column pick happens outside).
    v = jnp.maximum(jnp.maximum(r0_ref[...], r1_ref[...]), r2_ref[...])
    wout = o_ref.shape[2]
    h = jnp.maximum(v[:, :, 0:wout, :], v[:, :, 1:wout + 1, :])
    h = jnp.maximum(h, v[:, :, 2:wout + 2, :])
    o_ref[...] = h


def _upsample2x_kernel(xlo_ref, xhi_ref, g_ref, o_ref, *, h_in):
    # One output row per grid step: lerp the two source rows (weights computed
    # in-kernel with exact integer arithmetic), then interpolate the width
    # direction with a small static matrix on the MXU.
    r = pl.program_id(0)
    denom = 2 * h_in - 1
    num = r * (h_in - 1)
    lo = num // denom
    wh = (num - lo * denom).astype(jnp.float32) / float(denom)
    wl = 1.0 - wh
    a = xlo_ref[...].astype(jnp.float32)
    b = xhi_ref[...].astype(jnp.float32)
    v = a * wl + b * wh                      # (N, 1, W, C) f32
    g = g_ref[...]                           # (2W, W) f32
    n = v.shape[0]
    for i in range(n):                       # N is small and static
        row = jnp.dot(g, v[i, 0], preferred_element_type=jnp.float32)
        o_ref[i, 0] = row.astype(o_ref.dtype)


# ----------------------------- fused conv matmul -----------------------------

def _pick_tiles(m, npad):
    tn = min(512, npad)                      # npad is a multiple of 128 -> divides
    tm = min(_TM_CAP, _round_up(m, 8))
    # v7x megacore: make sure there are at least two (i, j) tiles so both
    # TensorCores get work (harmless on single-TC v5e/v6e).
    if pl.cdiv(m, tm) * (npad // tn) < 2:
        if npad >= 256:
            tn = npad // 2
        elif m > 8:
            tm = max(8, _round_up(pl.cdiv(m, 2), 8))
    return tm, tn


@functools.partial(jax.jit, static_argnames=("relu", "n_out"))
def matmul_bn(x, w, shift, residual, *, relu, n_out):
    """maybe_relu((x @ w) + shift [+ residual]); BN scale folded into w, w N-padded."""
    m, k = x.shape
    kw_, npad = w.shape
    assert k == kw_
    tm, tn = _pick_tiles(m, npad)
    grid = (pl.cdiv(m, tm), npad // tn)

    in_specs = [
        pl.BlockSpec((tm, k), lambda i, j: (i, 0)),     # full-K: single reduction step
        pl.BlockSpec((k, tn), lambda i, j: (0, j)),
        pl.BlockSpec((1, tn), lambda i, j: (0, j)),
    ]
    operands = [x, w, shift]
    if residual is not None:
        in_specs.append(pl.BlockSpec((tm, tn), lambda i, j: (i, j)))
        operands.append(residual)
        kernel = functools.partial(_matmul_bn_res_kernel, relu=relu)
    else:
        kernel = functools.partial(_matmul_bn_kernel, relu=relu)

    out = pl.pallas_call(
        kernel,
        out_shape=jax.ShapeDtypeStruct((m, npad), jnp.bfloat16),
        grid_spec=pltpu.PrefetchScalarGridSpec(
            num_scalar_prefetch=0,
            grid=grid,
            in_specs=in_specs,
            out_specs=pl.BlockSpec((tm, tn), lambda i, j: (i, j)),
        ),
        compiler_params=pltpu.CompilerParams(
            dimension_semantics=("parallel", "parallel"),
            vmem_limit_bytes=_VMEM_LIMIT),
    )(*operands)

    if npad != n_out:
        out = out[:, :n_out]
    return out


def _im2col(x, kh, kw, stride, pad):
    # TODO(synk): replace with implicit-GEMM (per-tap accumulation with halo'd row
    # blocks) to avoid materializing the kh*kw-expanded activation in HBM.
    if pad > 0:
        x = jnp.pad(x, ((0, 0), (pad, pad), (pad, pad), (0, 0)))
    n, h, w, c = x.shape
    ho = (h - kh) // stride + 1
    wo = (w - kw) // stride + 1
    if kh == 1 and kw == 1 and stride == 1:
        return x.reshape(n * ho * wo, c), (n, ho, wo)
    cols = []
    for i in range(kh):
        for j in range(kw):
            cols.append(x[:, i:i + stride * ho:stride, j:j + stride * wo:stride, :])
    patches = cols[0] if len(cols) == 1 else jnp.concatenate(cols, axis=-1)
    return patches.reshape(n * ho * wo, kh * kw * c), (n, ho, wo)


def conv_bn(x, p, *, stride, pad, relu, residual=None):
    xb = x.astype(jnp.bfloat16)
    patches, (n, ho, wo) = _im2col(xb, p["kh"], p["kw"], stride, pad)
    res2d = None
    if residual is not None:
        res2d = residual.reshape(n * ho * wo, p["cout"])
    y = matmul_bn(patches, p["w"], p["shift"], res2d, relu=relu, n_out=p["cout"])
    return y.reshape(n, ho, wo, p["cout"])


# ----------------------------- maxpool -----------------------------

@jax.jit
def maxpool_3x3_s2(x):
    """MaxPool2d(kernel=3, stride=2, padding=1) on NHWC, gridded over output rows."""
    n, h, w, c = x.shape
    ho = (h + 2 - 3) // 2 + 1
    wo = (w + 2 - 3) // 2 + 1
    xp = jnp.pad(x, ((0, 0), (1, 1), (1, 1), (0, 0)), constant_values=-jnp.inf)
    wp = w + 2

    hmax = pl.pallas_call(
        _maxpool_kernel,
        out_shape=jax.ShapeDtypeStruct((n, ho, w, c), x.dtype),
        grid_spec=pltpu.PrefetchScalarGridSpec(
            num_scalar_prefetch=0,
            grid=(ho,),
            in_specs=[
                pl.BlockSpec((n, 1, wp, c), lambda r: (0, 2 * r, 0, 0)),
                pl.BlockSpec((n, 1, wp, c), lambda r: (0, 2 * r + 1, 0, 0)),
                pl.BlockSpec((n, 1, wp, c), lambda r: (0, 2 * r + 2, 0, 0)),
            ],
            out_specs=pl.BlockSpec((n, 1, w, c), lambda r: (0, r, 0, 0)),
        ),
        compiler_params=pltpu.CompilerParams(
            dimension_semantics=("parallel",),
            vmem_limit_bytes=_VMEM_LIMIT),
    )(xp, xp, xp)

    # cheap stride-2 column pick of the already row/column-maxed tensor
    return hmax[:, :, 0:2 * wo:2, :]


# ----------------------------- bilinear x2 upsample -----------------------------

def _upsample_gmat(w):
    """Static (2W, W) width-interpolation matrix for bilinear x2, align_corners=True."""
    wo = 2 * w
    g = np.zeros((wo, w), np.float32)
    if w == 1:
        g[:, 0] = 1.0
    else:
        src = np.arange(wo, dtype=np.float64) * (w - 1) / (wo - 1)
        lo = np.floor(src).astype(np.int64)
        hi = np.minimum(lo + 1, w - 1)
        whw = (src - lo).astype(np.float32)
        for o in range(wo):
            g[o, lo[o]] += 1.0 - whw[o]
            g[o, hi[o]] += whw[o]
    return jnp.asarray(g)


@jax.jit
def upsample_bilinear_2x(x):
    """F.interpolate(scale_factor=2, mode='bilinear', align_corners=True), fused."""
    n, h, w, c = x.shape
    g = _upsample_gmat(w)

    def lo_map(r):
        return (0, (r * (h - 1)) // (2 * h - 1), 0, 0)

    def hi_map(r):
        lo = (r * (h - 1)) // (2 * h - 1)
        return (0, jnp.minimum(lo + 1, h - 1), 0, 0)

    return pl.pallas_call(
        functools.partial(_upsample2x_kernel, h_in=h),
        out_shape=jax.ShapeDtypeStruct((n, 2 * h, 2 * w, c), x.dtype),
        grid_spec=pltpu.PrefetchScalarGridSpec(
            num_scalar_prefetch=0,
            grid=(2 * h,),
            in_specs=[
                pl.BlockSpec((n, 1, w, c), lo_map),
                pl.BlockSpec((n, 1, w, c), hi_map),
                pl.BlockSpec((2 * w, w), lambda r: (0, 0)),
            ],
            out_specs=pl.BlockSpec((n, 1, 2 * w, c), lambda r: (0, r, 0, 0)),
        ),
        compiler_params=pltpu.CompilerParams(
            dimension_semantics=("parallel",),
            vmem_limit_bytes=_VMEM_LIMIT),
    )(x, x, g)


# ----------------------------- ResNet-50 parameters -----------------------------

class _KeyGen:
    def __init__(self, key):
        self._key = key
        self._i = 0

    def __call__(self):
        self._i += 1
        return jax.random.fold_in(self._key, self._i)


def _conv_bn_params(kg, kh, kw, cin, cout):
    k = kh * kw * cin
    w = jax.random.normal(kg(), (k, cout), jnp.float32) * jnp.sqrt(2.0 / k)
    gamma = 1.0 + 0.1 * jax.random.normal(kg(), (cout,), jnp.float32)
    beta = 0.1 * jax.random.normal(kg(), (cout,), jnp.float32)
    # eval-mode BN folded (running_mean=0, running_var=1, eps=1e-5): scale into W.
    scale = gamma / jnp.sqrt(1.0 + 1e-5)
    npad = _round_up(cout, 128)
    w_folded = jnp.pad(w * scale[None, :], ((0, 0), (0, npad - cout))).astype(jnp.bfloat16)
    shift = jnp.pad(beta.reshape(1, cout), ((0, 0), (0, npad - cout)))
    return dict(w=w_folded, shift=shift, kh=kh, kw=kw, cout=cout)


def _bottleneck_params(kg, cin, planes, stride):
    ds = None
    if stride != 1 or cin != planes * 4:
        ds = _conv_bn_params(kg, 1, 1, cin, planes * 4)
    return dict(
        conv1=_conv_bn_params(kg, 1, 1, cin, planes),
        conv2=_conv_bn_params(kg, 3, 3, planes, planes),
        conv3=_conv_bn_params(kg, 1, 1, planes, planes * 4),
        downsample=ds,
        stride=stride,
    )


def _make_layer_params(kg, cin, planes, blocks, stride):
    ps = [_bottleneck_params(kg, cin, planes, stride)]
    for _ in range(blocks - 1):
        ps.append(_bottleneck_params(kg, planes * 4, planes, 1))
    return ps


def make_resnet50_params(key):
    kg = _KeyGen(key)
    return dict(
        conv1=_conv_bn_params(kg, 7, 7, 3, 64),
        layer1=_make_layer_params(kg, 64, 64, 3, 1),
        layer2=_make_layer_params(kg, 256, 128, 4, 2),
        layer3=_make_layer_params(kg, 512, 256, 6, 2),
        layer4=_make_layer_params(kg, 1024, 512, 3, 2),
    )


def bottleneck_forward(x, p):
    out = conv_bn(x, p["conv1"], stride=1, pad=0, relu=True)
    out = conv_bn(out, p["conv2"], stride=p["stride"], pad=1, relu=True)
    if p["downsample"] is not None:
        identity = conv_bn(x, p["downsample"], stride=p["stride"], pad=0, relu=False)
    else:
        identity = x
    # residual add + ReLU fused into the conv3 matmul epilogue
    return conv_bn(out, p["conv3"], stride=1, pad=0, relu=True, residual=identity)


# ----------------------------- ShareConv forward -----------------------------

def share_conv_forward(inputs_nchw, params):
    x = jnp.transpose(inputs_nchw, (0, 2, 3, 1))  # NCHW -> NHWC
    # backbone children order: conv1, bn1, relu, maxpool, layer1..layer4 (break after layer4)
    x = conv_bn(x, params["conv1"], stride=2, pad=3, relu=True)
    x = maxpool_3x3_s2(x)
    for blk in params["layer1"]:
        x = bottleneck_forward(x, blk)
    d4 = x
    for blk in params["layer2"]:
        x = bottleneck_forward(x, blk)
    d8 = x
    for blk in params["layer3"]:
        x = bottleneck_forward(x, blk)
    d16 = x
    for blk in params["layer4"]:
        x = bottleneck_forward(x, blk)
    d32 = x
    # torch.cat(dim=1) over NCHW channels == concatenate over the last NHWC axis
    u1 = jnp.concatenate([upsample_bilinear_2x(d32), d16], axis=-1)
    u2 = jnp.concatenate([upsample_bilinear_2x(u1), d8], axis=-1)
    u3 = jnp.concatenate([upsample_bilinear_2x(u2), d4], axis=-1)
    # ShareConv.forward returns `inputs` unchanged; pyramid returned for inspection.
    return inputs_nchw, (u1, u2, u3)


if __name__ == "__main__":
    key = jax.random.PRNGKey(0)
    pkey, xkey = jax.random.split(key)
    params = make_resnet50_params(pkey)
    x = jax.random.normal(xkey, (2, 3, 64, 64), jnp.float32)  # small NCHW input

    out, (u1, u2, u3) = share_conv_forward(x, params)
    jax.block_until_ready((out, u1, u2, u3))

    assert out.shape == x.shape and out.dtype == x.dtype
    assert u1.shape == (2, 4, 4, 3072)     # NHWC of torch (2, 3072, 4, 4)
    assert u2.shape == (2, 8, 8, 3584)     # NHWC of torch (2, 3584, 8, 8)
    assert u3.shape == (2, 16, 16, 3840)   # NHWC of torch (2, 3840, 16, 16)
    print("KERNEL_OK")
</pallas_src>

<mosaic_0001>
module attributes {stable_mosaic.version = 11 : i64} {
  func.func @_matmul_bn_kernel(%arg0: i32, %arg1: i32, %arg2: memref<512x147xbf16, #tpu.memory_space<vmem>>, %arg3: memref<147x128xbf16, #tpu.memory_space<vmem>>, %arg4: memref<1x128xf32, #tpu.memory_space<vmem>>, %arg5: memref<512x128xbf16, #tpu.memory_space<vmem>>) attributes {dimension_semantics = [#tpu.dimension_semantics<parallel>, #tpu.dimension_semantics<parallel>], iteration_bounds = array<i64: 4, 1>, scalar_prefetch = 0 : i64, scratch_operands = 0 : i64, tpu.core_type = #tpu.core_type<tc>, window_params = [{transform_indices = @transform_0, window_bounds = array<i64: 512, 147>}, {transform_indices = @transform_1, window_bounds = array<i64: 147, 128>}, {transform_indices = @transform_2, window_bounds = array<i64: 1, 128>}, {transform_indices = @transform_3, window_bounds = array<i64: 512, 128>}]} {
    %c0 = arith.constant 0 : index
    %c0_0 = arith.constant 0 : index
    %0 = vector.load %arg2[%c0, %c0_0] : memref<512x147xbf16, #tpu.memory_space<vmem>>, vector<512x147xbf16>
    %c0_1 = arith.constant 0 : index
    %c0_2 = arith.constant 0 : index
    %1 = vector.load %arg3[%c0_1, %c0_2] : memref<147x128xbf16, #tpu.memory_space<vmem>>, vector<147x128xbf16>
    %cst = arith.constant dense<0.000000e+00> : vector<512x128xf32>
    %2 = tpu.matmul %0, %1, %cst {dimension_numbers = #tpu.dot_dimension_numbers<[1], [0], [0], [1], [0, 0, 1, 1], [], []>} : vector<512x147xbf16>, vector<147x128xbf16>, vector<512x128xf32> -> vector<512x128xf32>
    %c0_3 = arith.constant 0 : index
    %c0_4 = arith.constant 0 : index
    %3 = vector.load %arg4[%c0_3, %c0_4] : memref<1x128xf32, #tpu.memory_space<vmem>>, vector<1x128xf32>
    %4 = vector.broadcast %3 : vector<1x128xf32> to vector<512x128xf32>
    %5 = arith.addf %2, %4 : vector<512x128xf32>
    %cst_5 = arith.constant 0.000000e+00 : f32
    %6 = vector.broadcast %cst_5 : f32 to vector<512x128xf32>
    %7 = arith.maximumf %5, %6 : vector<512x128xf32>
    %8 = arith.truncf %7 : vector<512x128xf32> to vector<512x128xbf16>
    %c0_6 = arith.constant 0 : index
    %c0_7 = arith.constant 0 : index
    %9 = vector.load %arg5[%c0_6, %c0_7] : memref<512x128xbf16, #tpu.memory_space<vmem>>, vector<512x128xbf16>
    tpu.vector_store %arg5[%c0_6, %c0_7], %8 {strides = array<i32>} : memref<512x128xbf16, #tpu.memory_space<vmem>>, vector<512x128xbf16>,
    return
  }
  func.func @transform_0(%arg0: i32, %arg1: i32) -> (i32, i32) {
    %c0_i32 = arith.constant 0 : i32
    %c0_i32_0 = arith.constant 0 : i32
    return %arg0, %c0_i32 : i32, i32
  }
  func.func @transform_1(%arg0: i32, %arg1: i32) -> (i32, i32) {
    %c0_i32 = arith.constant 0 : i32
    %c0_i32_0 = arith.constant 0 : i32
    return %c0_i32, %arg1 : i32, i32
  }
  func.func @transform_2(%arg0: i32, %arg1: i32) -> (i32, i32) {
    %c0_i32 = arith.constant 0 : i32
    %c0_i32_0 = arith.constant 0 : i32
    return %c0_i32, %arg1 : i32, i32
  }
  func.func @transform_3(%arg0: i32, %arg1: i32) -> (i32, i32) {
    %c0_i32 = arith.constant 0 : i32
    return %arg0, %arg1 : i32, i32
  }
}

</mosaic_0001>

<bundles_post_ra>
// kernel: matmul_bn.1
= control target key start
LH: loop header
LB: loop body
LE: loop exit
PB: predicated region body
PF: predicated region fallthrough
CT: control target
= control target key end

     0   :  { %s2182_s12 = smov 0   ;;  %s2184_s13 = smov 0   ;;  %s2450_s0 = inlined_call_operand.vmem [shape: bf16[2048,147], index: 0, kind: input, shape index: {}]   ;;  %s2451_s1 = inlined_call_operand.vmem [shape: bf16[147,128], index: 1, kind: input, shape index: {}]   ;;  %s2452_s2 = inlined_call_operand.vmem [shape: f32[1,128], index: 2, kind: input, shape index: {}]   ;;  %s2453_s3 = inlined_call_operand.vmem [shape: bf16[2048,128], index: 3, kind: output, shape index: {}]  }
   0x1   :  { %s2186_s14 = smov 0  }
   0x2 LB: > { %s25_s15 = sadd.s32 1, %s2154_s13  ;;  %p1549_p0 = scmp.ge.s32.totalorder %s2158_s14, 1  ;;  %s2158_s14 = sphi %s2186_s14, %s13_s14   ;;  %s2154_s13 = sphi %s2184_s13, %s2455_s13   ;;  %s2150_s12 = sphi %s2182_s12, %s2454_s12  }
   0x3   : > { %p27_p1 = scmp.ge.s32.totalorder %s25_s15, 4  ;;  %p170_p2 = scmp.lt.s32.totalorder %s2158_s14, 5 }
   0x5   : > { %s2457_s15 = smov (%p27_p1, %s25_s15), 0  ;;  %p171_p3 = pnand %p1549_p0, %p170_p2 }
   0x6   : > { %s1550_s22 = sshll.u32 (!%p171_p3), %s2150_s12, 6 }
   0x7   : > { %174 = sbr.rel (%p171_p3) target bundleno = 377 (0x179), region = 32  ;;  %p206_p4 = scmp.lt.s32.totalorder (!%p171_p3), %s1550_s22, 255 }
   0xc   : > { %v2030_v0 = vld [vmem:[%s2451_s1 + $0x38] sm:$0xff]   ;;  %v2160_v1 = vmov 0   ;;  %v2031_v2 = vld [vmem:[%s2451_s1 + $0x30] sm:$0xff]   ;;  %v2032_v3 = vld [vmem:[%s2451_s1 + $0x28] sm:$0xff]   ;;  %s2459_s22 = smov (!%p206_p4, %s1550_s22), 255  ;;  %vm664_vm0 = vcmask 154624  }
   0xd   : > { %768 = vmatprep.subr.bf16.mxu0 %v2160_v1  ;;  %1984 = vmatprep.subr.bf16.mxu1 %v2160_v1  ;;  %v2033_v4 = vld [vmem:[%s2451_s1 + $0x20] sm:$0xff]   ;;  %s1728_s25 = sshll.u32 %s2459_s22, 3  ;;  %v2034_v5 = vld [vmem:[%s2451_s1 + $0x18] sm:$0xff]   ;;  %v2035_v8 = vld [vmem:[%s2451_s1 + $0x10] sm:$0xff]   ;;  %vm761_vm1 = vcmask 1040384   ;;  %vm762_vm2 = vcmask 1041408  }
   0xe   : > { %769 = vmatpush1.bf16.msra.mxu0 %v2030_v0  ;;  %1994 = vmatpush1.bf16.msra.mxu1 %v2030_v0  ;;  %s2218_s28 = scalar_lea.vmem %s2450_s0, %s1728_s25  ;;  %v2036_v9 = vld [vmem:[%s2451_s1 + $0x8] sm:$0xff]   ;;  %v2161_v10 = vmov 65535   ;;  %v2037_v12 = vld [vmem:[%s2451_s1] sm:$0xff]   ;;  %s1554_s19 = sshll.u32 %s2459_s22, 2 }
   0xf   : > { %770 = vmatprep.subr.bf16.mxu0 %v2160_v1  ;;  %1985 = vmatprep.subr.bf16.mxu1 %v2160_v1  ;;  %v2042_v6 = vld [vmem:[%s2218_s28 + $0x4] ss:$8 sps:$4 sm:$0xff]   ;;  %v763_v11 = vsel %vm761_vm1, 4294967295, %v2161_v10  ;;  %v2038_v13 = vld [vmem:[%s2451_s1 + $0x48] ss:$0 sps:$4 sm:$0x33]   ;;  %s2347_s23 = scalar_lea.vmem %s2453_s3, %s1554_s19 }
  0x10   : > { %v2045_v7 = vld [vmem:[%s2218_s28 + $0x104] ss:$8 sps:$4 sm:$0xff]   ;;  %1630 = vmatprep.mubr.msk.bf16.mxu0 %vm664_vm0, %v2042_v6  ;;  %v764_v14 = vsel %vm762_vm2, %v763_v11, 0  ;;  %v2040_v17 = vld [vmem:[%s2218_s28] ss:$8 sps:$4 sm:$0xff]  }
  0x11   : > { %1646 = vmatprep.mubr.msk.bf16.mxu1 %vm664_vm0, %v2045_v7  ;;  %v766_v15 = vand.u32 %v2038_v13, %v764_v14  ;;  %v2039_v16 = vld [vmem:[%s2451_s1 + $0x40] sm:$0xff]   ;;  %v2046_v19 = vld [vmem:[%s2218_s28 + $0x14] ss:$8 sps:$4 sm:$0xff]   ;;  %v2050_v21 = vld [vmem:[%s2218_s28 + $0x10] ss:$8 sps:$4 sm:$0xff]  }
  0x12   : > { %771 = vmatpush1.bf16.msra.mxu0 %v2031_v2  ;;  %1995 = vmatpush1.bf16.msra.mxu1 %v2031_v2  ;;  %v2043_v18 = vld [vmem:[%s2218_s28 + $0x100] ss:$8 sps:$4 sm:$0xff]   ;;  %v2048_v20 = vld [vmem:[%s2218_s28 + $0x114] ss:$8 sps:$4 sm:$0xff]   ;;  %v2051_v22 = vld [vmem:[%s2218_s28 + $0x110] ss:$8 sps:$4 sm:$0xff]  }
  0x13   : > { %772 = vmatprep.subr.bf16.mxu0 %v2160_v1  ;;  %1986 = vmatprep.subr.bf16.mxu1 %v2160_v1  ;;  %v2052_v23 = vld [vmem:[%s2218_s28 + $0x24] ss:$8 sps:$4 sm:$0xff]   ;;  %v2056_v25 = vld [vmem:[%s2218_s28 + $0x20] ss:$8 sps:$4 sm:$0xff]   ;;  %v2058_v27 = vld [vmem:[%s2218_s28 + $0x34] ss:$8 sps:$4 sm:$0xff]  }
  0x14   : > { %v2054_v24 = vld [vmem:[%s2218_s28 + $0x124] ss:$8 sps:$4 sm:$0xff]   ;;  %v2057_v26 = vld [vmem:[%s2218_s28 + $0x120] ss:$8 sps:$4 sm:$0xff]   ;;  %v2060_v28 = vld [vmem:[%s2218_s28 + $0x134] ss:$8 sps:$4 sm:$0xff]  }
  0x15   : > { %v2062_v29 = vld [vmem:[%s2218_s28 + $0x30] ss:$8 sps:$4 sm:$0xff]   ;;  %v2064_v31 = vld [vmem:[%s2218_s28 + $0x44] ss:$8 sps:$4 sm:$0xff]   ;;  %v2068_v33 = vld [vmem:[%s2218_s28 + $0x40] ss:$8 sps:$4 sm:$0xff]  }
  0x16   : > { %773 = vmatpush1.bf16.msra.mxu0 %v2032_v3  ;;  %1996 = vmatpush1.bf16.msra.mxu1 %v2032_v3  ;;  %v2063_v30 = vld [vmem:[%s2218_s28 + $0x130] ss:$8 sps:$4 sm:$0xff]   ;;  %v2066_v32 = vld [vmem:[%s2218_s28 + $0x144] ss:$8 sps:$4 sm:$0xff]   ;;  %v2069_v34 = vld [vmem:[%s2218_s28 + $0x140] ss:$8 sps:$4 sm:$0xff]  }
  0x17   : > { %774 = vmatprep.subr.bf16.mxu0 %v2160_v1  ;;  %1987 = vmatprep.subr.bf16.mxu1 %v2160_v1  ;;  %v2070_v35 = vld [vmem:[%s2218_s28 + $0x54] ss:$8 sps:$4 sm:$0xff]   ;;  %v2074_v37 = vld [vmem:[%s2218_s28 + $0x50] ss:$8 sps:$4 sm:$0xff]   ;;  %v2076_v39 = vld [vmem:[%s2218_s28 + $0x64] ss:$8 sps:$4 sm:$0xff]  }
  0x18   : > { %v2072_v36 = vld [vmem:[%s2218_s28 + $0x154] ss:$8 sps:$4 sm:$0xff]   ;;  %v2075_v38 = vld [vmem:[%s2218_s28 + $0x150] ss:$8 sps:$4 sm:$0xff]   ;;  %v2078_v40 = vld [vmem:[%s2218_s28 + $0x164] ss:$8 sps:$4 sm:$0xff]  }
  0x19   : > { %v2080_v41 = vld [vmem:[%s2218_s28 + $0x60] ss:$8 sps:$4 sm:$0xff]   ;;  %v2082_v43 = vld [vmem:[%s2218_s28 + $0x74] ss:$8 sps:$4 sm:$0xff]   ;;  %v2086_v45 = vld [vmem:[%s2218_s28 + $0x70] ss:$8 sps:$4 sm:$0xff]  }
  0x1a   : > { %775 = vmatpush1.bf16.msra.mxu0 %v2033_v4  ;;  %1997 = vmatpush1.bf16.msra.mxu1 %v2033_v4  ;;  %v2081_v42 = vld [vmem:[%s2218_s28 + $0x160] ss:$8 sps:$4 sm:$0xff]   ;;  %v2084_v44 = vld [vmem:[%s2218_s28 + $0x174] ss:$8 sps:$4 sm:$0xff]   ;;  %v2087_v46 = vld [vmem:[%s2218_s28 + $0x170] ss:$8 sps:$4 sm:$0xff]  }
  0x1b   : > { %776 = vmatprep.subr.bf16.mxu0 %v2160_v1  ;;  %1988 = vmatprep.subr.bf16.mxu1 %v2160_v1  ;;  %v2088_v47 = vld [vmem:[%s2218_s28 + $0x84] ss:$8 sps:$4 sm:$0xff]   ;;  %v2092_v49 = vld [vmem:[%s2218_s28 + $0x80] ss:$8 sps:$4 sm:$0xff]   ;;  %v2094_v51 = vld [vmem:[%s2218_s28 + $0x94] ss:$8 sps:$4 sm:$0xff]  }
  0x1c   : > { %v2090_v48 = vld [vmem:[%s2218_s28 + $0x184] ss:$8 sps:$4 sm:$0xff]   ;;  %v2093_v50 = vld [vmem:[%s2218_s28 + $0x180] ss:$8 sps:$4 sm:$0xff]   ;;  %v2096_v52 = vld [vmem:[%s2218_s28 + $0x194] ss:$8 sps:$4 sm:$0xff]  }
  0x1d   : > { %v2098_v53 = vld [vmem:[%s2218_s28 + $0x90] ss:$8 sps:$4 sm:$0xff]   ;;  %v2100_v55 = vld [vmem:[%s2218_s28 + $0xa4] ss:$8 sps:$4 sm:$0xff]   ;;  %v2104_v57 = vld [vmem:[%s2218_s28 + $0xa0] ss:$8 sps:$4 sm:$0xff]  }
  0x1e   : > { %777 = vmatpush1.bf16.msra.mxu0 %v2034_v5  ;;  %1998 = vmatpush1.bf16.msra.mxu1 %v2034_v5  ;;  %v2099_v54 = vld [vmem:[%s2218_s28 + $0x190] ss:$8 sps:$4 sm:$0xff]   ;;  %v2102_v56 = vld [vmem:[%s2218_s28 + $0x1a4] ss:$8 sps:$4 sm:$0xff]   ;;  %v2105_v58 = vld [vmem:[%s2218_s28 + $0x1a0] ss:$8 sps:$4 sm:$0xff]  }
  0x1f   : > { %778 = vmatprep.subr.bf16.mxu0 %v2160_v1  ;;  %1989 = vmatprep.subr.bf16.mxu1 %v2160_v1  ;;  %v2106_v59 = vld [vmem:[%s2218_s28 + $0xb4] ss:$8 sps:$4 sm:$0xff]   ;;  %v2110_v61 = vld [vmem:[%s2218_s28 + $0xb0] ss:$8 sps:$4 sm:$0xff]   ;;  %v2112_v63 = vld [vmem:[%s2218_s28 + $0xc4] ss:$8 sps:$4 sm:$0xff]  }
  0x20   : > { %v2108_v60 = vld [vmem:[%s2218_s28 + $0x1b4] ss:$8 sps:$4 sm:$0xff]   ;;  %v2111_v62 = vld [vmem:[%s2218_s28 + $0x1b0] ss:$8 sps:$4 sm:$0xff]   ;;  %v2114_v0 = vld [vmem:[%s2218_s28 + $0x1c4] ss:$8 sps:$4 sm:$0xff]  }
  0x21   : > { %v2117_v2 = vld [vmem:[%s2218_s28 + $0x1c0] ss:$8 sps:$4 sm:$0xff]   ;;  %v2118_v3 = vld [vmem:[%s2218_s28 + $0xd4] ss:$8 sps:$4 sm:$0xff]   ;;  %v2122_v5 = vld [vmem:[%s2218_s28 + $0xd0] ss:$8 sps:$4 sm:$0xff]  }
  0x22   : > { %779 = vmatpush1.bf16.msra.mxu0 %v2035_v8  ;;  %1999 = vmatpush1.bf16.msra.mxu1 %v2035_v8  ;;  %v2120_v4 = vld [vmem:[%s2218_s28 + $0x1d4] ss:$8 sps:$4 sm:$0xff]   ;;  %v2123_v6 = vld [vmem:[%s2218_s28 + $0x1d0] ss:$8 sps:$4 sm:$0xff]   ;;  %v2124_v7 = vld [vmem:[%s2218_s28 + $0xe4] ss:$8 sps:$4 sm:$0xff]  }
  0x23   : > { %780 = vmatprep.subr.bf16.mxu0 %v2160_v1  ;;  %1990 = vmatprep.subr.bf16.mxu1 %v2160_v1  ;;  %v2126_v8 = vld [vmem:[%s2218_s28 + $0x1e4] ss:$8 sps:$4 sm:$0xff]   ;;  %v2129_v10 = vld [vmem:[%s2218_s28 + $0x1e0] ss:$8 sps:$4 sm:$0xff]   ;;  %v2130_v11 = vld [vmem:[%s2218_s28 + $0xf4] ss:$8 sps:$4 sm:$0xff]  }
  0x24   : > { %v2134_v13 = vld [vmem:[%s2218_s28 + $0xf0] ss:$8 sps:$4 sm:$0xff]  }
  0x25   : > { %v2135_v14 = vld [vmem:[%s2218_s28 + $0x1f0] ss:$8 sps:$4 sm:$0xff]  }
  0x26   : > { %781 = vmatpush1.bf16.msra.mxu0 %v2036_v9  ;;  %2000 = vmatpush1.bf16.msra.mxu1 %v2036_v9  ;;  %v2128_v9 = vld [vmem:[%s2218_s28 + $0xe0] ss:$8 sps:$4 sm:$0xff]  }
  0x27   : > { %782 = vmatprep.subr.bf16.mxu0 %v2160_v1  ;;  %1991 = vmatprep.subr.bf16.mxu1 %v2160_v1 }
  0x2a   : > { %783 = vmatpush1.bf16.msra.mxu0 %v2037_v12  ;;  %2001 = vmatpush1.bf16.msra.mxu1 %v2037_v12  ;;  %v2132_v12 = vld [vmem:[%s2218_s28 + $0x1f4] ss:$8 sps:$4 sm:$0xff]  }
  0x2b   : > { %796 = vmatprep.subr.bf16.mxu0 %v2160_v1  ;;  %1992 = vmatprep.subr.bf16.mxu1 %v2160_v1 }
  0x2e   : > { %797 = vmatpush2.bf16.msra.mxu0 %v766_v15  ;;  %2002 = vmatpush2.bf16.msra.mxu1 %v766_v15  ;;  %v2337_v15 = vld [vmem:[%s2452_s2] ss:$0 sm:$0xff] }
  0x2f   : > { %798 = vmatprep.subr.bf16.mxu0 %v2160_v1  ;;  %1993 = vmatprep.subr.bf16.mxu1 %v2160_v1  ;;  %v2116_v1 = vld [vmem:[%s2218_s28 + $0xc0] ss:$8 sps:$4 sm:$0xff]  }
  0x32   : > { %799 = vmatpush2.bf16.msra.mxu0 %v2039_v16  ;;  %2003 = vmatpush2.bf16.msra.mxu1 %v2039_v16 }
  0x35   : > { %801 = vmatmul.mubr.bf16.vlgmr.msra.gmra.mxu0 %v2040_v17  ;;  %929 = vmatmul.mubr.bf16.vlgmr.msra.gmra.mxu1 %v2043_v18 }
  0x36   : > { %1631 = vmatprep.mubr.msk.bf16.mxu0 %vm664_vm0, %v2046_v19  ;;  %1647 = vmatprep.mubr.msk.bf16.mxu1 %vm664_vm0, %v2048_v20 }
  0x3d   : > { %809 = vmatmul.mubr.bf16.gmra.mxu0 %v2050_v21  ;;  %937 = vmatmul.mubr.bf16.gmra.mxu1 %v2051_v22 }
  0x3e   : > { %1632 = vmatprep.mubr.msk.bf16.mxu0 %vm664_vm0, %v2052_v23  ;;  %1648 = vmatprep.mubr.msk.bf16.mxu1 %vm664_vm0, %v2054_v24 }
  0x45   : > { %817 = vmatmul.mubr.bf16.gmra.mxu0 %v2056_v25  ;;  %945 = vmatmul.mubr.bf16.gmra.mxu1 %v2057_v26 }
  0x46   : > { %1633 = vmatprep.mubr.msk.bf16.mxu0 %vm664_vm0, %v2058_v27  ;;  %1649 = vmatprep.mubr.msk.bf16.mxu1 %vm664_vm0, %v2060_v28 }
  0x4d   : > { %825 = vmatmul.mubr.bf16.gmra.mxu0 %v2062_v29  ;;  %953 = vmatmul.mubr.bf16.gmra.mxu1 %v2063_v30 }
  0x4e   : > { %1634 = vmatprep.mubr.msk.bf16.mxu0 %vm664_vm0, %v2064_v31  ;;  %1650 = vmatprep.mubr.msk.bf16.mxu1 %vm664_vm0, %v2066_v32 }
  0x55   : > { %833 = vmatmul.mubr.bf16.gmra.mxu0 %v2068_v33  ;;  %961 = vmatmul.mubr.bf16.gmra.mxu1 %v2069_v34 }
  0x56   : > { %1635 = vmatprep.mubr.msk.bf16.mxu0 %vm664_vm0, %v2070_v35  ;;  %1651 = vmatprep.mubr.msk.bf16.mxu1 %vm664_vm0, %v2072_v36 }
  0x5d   : > { %841 = vmatmul.mubr.bf16.gmra.mxu0 %v2074_v37  ;;  %969 = vmatmul.mubr.bf16.gmra.mxu1 %v2075_v38 }
  0x5e   : > { %1636 = vmatprep.mubr.msk.bf16.mxu0 %vm664_vm0, %v2076_v39  ;;  %1652 = vmatprep.mubr.msk.bf16.mxu1 %vm664_vm0, %v2078_v40 }
  0x65   : > { %849 = vmatmul.mubr.bf16.gmra.mxu0 %v2080_v41  ;;  %977 = vmatmul.mubr.bf16.gmra.mxu1 %v2081_v42 }
  0x66   : > { %1637 = vmatprep.mubr.msk.bf16.mxu0 %vm664_vm0, %v2082_v43  ;;  %1653 = vmatprep.mubr.msk.bf16.mxu1 %vm664_vm0, %v2084_v44 }
  0x6d   : > { %857 = vmatmul.mubr.bf16.gmra.mxu0 %v2086_v45  ;;  %985 = vmatmul.mubr.bf16.gmra.mxu1 %v2087_v46 }
  0x6e   : > { %1638 = vmatprep.mubr.msk.bf16.mxu0 %vm664_vm0, %v2088_v47  ;;  %1654 = vmatprep.mubr.msk.bf16.mxu1 %vm664_vm0, %v2090_v48 }
  0x75   : > { %865 = vmatmul.mubr.bf16.gmra.mxu0 %v2092_v49  ;;  %993 = vmatmul.mubr.bf16.gmra.mxu1 %v2093_v50 }
  0x76   : > { %1639 = vmatprep.mubr.msk.bf16.mxu0 %vm664_vm0, %v2094_v51  ;;  %1655 = vmatprep.mubr.msk.bf16.mxu1 %vm664_vm0, %v2096_v52 }
  0x7d   : > { %873 = vmatmul.mubr.bf16.gmra.mxu0 %v2098_v53  ;;  %1001 = vmatmul.mubr.bf16.gmra.mxu1 %v2099_v54 }
  0x7e   : > { %1640 = vmatprep.mubr.msk.bf16.mxu0 %vm664_vm0, %v2100_v55  ;;  %1656 = vmatprep.mubr.msk.bf16.mxu1 %vm664_vm0, %v2102_v56 }
  0x85   : > { %881 = vmatmul.mubr.bf16.gmra.mxu0 %v2104_v57  ;;  %1009 = vmatmul.mubr.bf16.gmra.mxu1 %v2105_v58 }
  0x86   : > { %1641 = vmatprep.mubr.msk.bf16.mxu0 %vm664_vm0, %v2106_v59  ;;  %1657 = vmatprep.mubr.msk.bf16.mxu1 %vm664_vm0, %v2108_v60 }
  0x8d   : > { %889 = vmatmul.mubr.bf16.gmra.mxu0 %v2110_v61  ;;  %1017 = vmatmul.mubr.bf16.gmra.mxu1 %v2111_v62 }
  0x8e   : > { %1642 = vmatprep.mubr.msk.bf16.mxu0 %vm664_vm0, %v2112_v63  ;;  %1658 = vmatprep.mubr.msk.bf16.mxu1 %vm664_vm0, %v2114_v0 }
  0x95   : > { %897 = vmatmul.mubr.bf16.gmra.mxu0 %v2116_v1  ;;  %1025 = vmatmul.mubr.bf16.gmra.mxu1 %v2117_v2 }
  0x96   : > { %1643 = vmatprep.mubr.msk.bf16.mxu0 %vm664_vm0, %v2118_v3  ;;  %1659 = vmatprep.mubr.msk.bf16.mxu1 %vm664_vm0, %v2120_v4 }
  0x9d   : > { %905 = vmatmul.mubr.bf16.gmra.mxu0 %v2122_v5  ;;  %1033 = vmatmul.mubr.bf16.gmra.mxu1 %v2123_v6 }
  0x9e   : > { %1644 = vmatprep.mubr.msk.bf16.mxu0 %vm664_vm0, %v2124_v7  ;;  %1660 = vmatprep.mubr.msk.bf16.mxu1 %vm664_vm0, %v2126_v8 }
  0xa5   : > { %913 = vmatmul.mubr.bf16.gmra.mxu0 %v2128_v9  ;;  %1041 = vmatmul.mubr.bf16.gmra.mxu1 %v2129_v10 }
  0xa6   : > { %1645 = vmatprep.mubr.msk.bf16.mxu0 %vm664_vm0, %v2130_v11  ;;  %1661 = vmatprep.mubr.msk.bf16.mxu1 %vm664_vm0, %v2132_v12 }
  0xad   : > { %921 = vmatmul.mubr.bf16.gmra.mxu0 %v2134_v13  ;;  %1049 = vmatmul.mubr.bf16.gmra.mxu1 %v2135_v14 }
  0xf5   : > { %v802_v16 = vpop.f32.mrf.mxu0  ;;  %v930_v17 = vpop.f32.mrf.mxu1 }
  0xf6   : > { %v803_v20 = vadd.f32 %v2337_v15, %v802_v16  ;;  %v931_v21 = vadd.f32 %v2337_v15, %v930_v17 }
  0xf7   : > { %v804_v18 = vpop.f32.mrf.mxu0  ;;  %v932_v19 = vpop.f32.mrf.mxu1 }
  0xf8   : > { %v1057_v28 = vmax.f32 %v803_v20, 0.0  ;;  %v1089_v29 = vmax.f32 %v931_v21, 0.0 }
  0xf9   : > { %v805_v22 = vpop.f32.mrf.mxu0  ;;  %v933_v23 = vpop.f32.mrf.mxu1 }
  0xfa   : > { %v806_v24 = vadd.f32 %v2337_v15, %v805_v22  ;;  %v934_v25 = vadd.f32 %v2337_v15, %v933_v23 }
  0xfb   : > { %v807_v26 = vpop.f32.mrf.mxu0  ;;  %v935_v27 = vpop.f32.mrf.mxu1 }
  0xfc   : > { %v1058_v30 = vmax.f32 %v806_v24, 0.0  ;;  %v1090_v31 = vmax.f32 %v934_v25, 0.0 }
  0xfd   : > { %v810_v32 = vpop.f32.mrf.mxu0  ;;  %v938_v33 = vpop.f32.mrf.mxu1 }
  0xfe   : > { %v1796_v34 = vpack.c.bf16 %v1058_v30, %v1057_v28  ;;  %v1876_v35 = vpack.c.bf16 %v1090_v31, %v1089_v29  ;;  %v811_v38 = vadd.f32 %v2337_v15, %v810_v32  ;;  %v939_v39 = vadd.f32 %v2337_v15, %v938_v33 }
  0xff   : > { %v812_v36 = vpop.f32.mrf.mxu0  ;;  %v940_v37 = vpop.f32.mrf.mxu1 }
 0x100   : > { %1797 = vst [vmem:[%s2347_s23] sm:$0xff] %v1796_v34   ;;  %1968 = vst [vmem:[%s2347_s23 + $0x80] sm:$0xff] %v1876_v35   ;;  %v1059_v46 = vmax.f32 %v811_v38, 0.0  ;;  %v1091_v47 = vmax.f32 %v939_v39, 0.0 }
 0x101   : > { %v813_v40 = vpop.f32.mrf.mxu0  ;;  %v941_v41 = vpop.f32.mrf.mxu1 }
 0x102   : > { %v814_v42 = vadd.f32 %v2337_v15, %v813_v40  ;;  %v942_v43 = vadd.f32 %v2337_v15, %v941_v41 }
 0x103   : > { %v815_v44 = vpop.f32.mrf.mxu0  ;;  %v943_v45 = vpop.f32.mrf.mxu1 }
 0x104   : > { %v1060_v48 = vmax.f32 %v814_v42, 0.0  ;;  %v1092_v49 = vmax.f32 %v942_v43, 0.0 }
 0x105   : > { %v818_v50 = vpop.f32.mrf.mxu0  ;;  %v946_v51 = vpop.f32.mrf.mxu1 }
 0x106   : > { %v1801_v52 = vpack.c.bf16 %v1060_v48, %v1059_v46  ;;  %v1881_v53 = vpack.c.bf16 %v1092_v49, %v1091_v47  ;;  %v819_v56 = vadd.f32 %v2337_v15, %v818_v50  ;;  %v947_v57 = vadd.f32 %v2337_v15, %v946_v51 }
 0x107   : > { %v820_v54 = vpop.f32.mrf.mxu0  ;;  %v948_v55 = vpop.f32.mrf.mxu1 }
 0x108   : > { %1953 = vst [vmem:[%s2347_s23 + $0x8] sm:$0xff] %v1801_v52   ;;  %1969 = vst [vmem:[%s2347_s23 + $0x88] sm:$0xff] %v1881_v53   ;;  %v1061_v0 = vmax.f32 %v819_v56, 0.0  ;;  %v1093_v1 = vmax.f32 %v947_v57, 0.0 }
 0x109   : > { %v821_v58 = vpop.f32.mrf.mxu0  ;;  %v949_v59 = vpop.f32.mrf.mxu1 }
 0x10a   : > { %v822_v60 = vadd.f32 %v2337_v15, %v821_v58  ;;  %v950_v61 = vadd.f32 %v2337_v15, %v949_v59 }
 0x10b   : > { %v823_v62 = vpop.f32.mrf.mxu0  ;;  %v951_v63 = vpop.f32.mrf.mxu1 }
 0x10c   : > { %v1062_v2 = vmax.f32 %v822_v60, 0.0  ;;  %v1094_v3 = vmax.f32 %v950_v61, 0.0 }
 0x10d   : > { %v826_v4 = vpop.f32.mrf.mxu0  ;;  %v954_v5 = vpop.f32.mrf.mxu1 }
 0x10e   : > { %v1806_v6 = vpack.c.bf16 %v1062_v2, %v1061_v0  ;;  %v1886_v7 = vpack.c.bf16 %v1094_v3, %v1093_v1  ;;  %v827_v10 = vadd.f32 %v2337_v15, %v826_v4  ;;  %v955_v11 = vadd.f32 %v2337_v15, %v954_v5 }
 0x10f   : > { %v828_v8 = vpop.f32.mrf.mxu0  ;;  %v956_v9 = vpop.f32.mrf.mxu1 }
 0x110   : > { %1954 = vst [vmem:[%s2347_s23 + $0x10] sm:$0xff] %v1806_v6   ;;  %1970 = vst [vmem:[%s2347_s23 + $0x90] sm:$0xff] %v1886_v7   ;;  %v1063_v19 = vmax.f32 %v827_v10, 0.0  ;;  %v1095_v20 = vmax.f32 %v955_v11, 0.0 }
 0x111   : > { %v829_v12 = vpop.f32.mrf.mxu0  ;;  %v957_v13 = vpop.f32.mrf.mxu1 }
 0x112   : > { %v830_v14 = vadd.f32 %v2337_v15, %v829_v12  ;;  %v958_v16 = vadd.f32 %v2337_v15, %v957_v13 }
 0x113   : > { %v831_v17 = vpop.f32.mrf.mxu0  ;;  %v959_v18 = vpop.f32.mrf.mxu1 }
 0x114   : > { %v1064_v21 = vmax.f32 %v830_v14, 0.0  ;;  %v1096_v22 = vmax.f32 %v958_v16, 0.0 }
 0x115   : > { %v834_v23 = vpop.f32.mrf.mxu0  ;;  %v962_v24 = vpop.f32.mrf.mxu1 }
 0x116   : > { %v1811_v25 = vpack.c.bf16 %v1064_v21, %v1063_v19  ;;  %v1891_v26 = vpack.c.bf16 %v1096_v22, %v1095_v20  ;;  %v835_v29 = vadd.f32 %v2337_v15, %v834_v23  ;;  %v963_v30 = vadd.f32 %v2337_v15, %v962_v24 }
 0x117   : > { %v836_v27 = vpop.f32.mrf.mxu0  ;;  %v964_v28 = vpop.f32.mrf.mxu1 }
 0x118   : > { %1955 = vst [vmem:[%s2347_s23 + $0x18] sm:$0xff] %v1811_v25   ;;  %1971 = vst [vmem:[%s2347_s23 + $0x98] sm:$0xff] %v1891_v26   ;;  %v1065_v37 = vmax.f32 %v835_v29, 0.0  ;;  %v1097_v38 = vmax.f32 %v963_v30, 0.0 }
 0x119   : > { %v837_v31 = vpop.f32.mrf.mxu0  ;;  %v965_v32 = vpop.f32.mrf.mxu1 }
 0x11a   : > { %v838_v33 = vadd.f32 %v2337_v15, %v837_v31  ;;  %v966_v34 = vadd.f32 %v2337_v15, %v965_v32 }
 0x11b   : > { %v839_v35 = vpop.f32.mrf.mxu0  ;;  %v967_v36 = vpop.f32.mrf.mxu1 }
 0x11c   : > { %v1066_v39 = vmax.f32 %v838_v33, 0.0  ;;  %v1098_v40 = vmax.f32 %v966_v34, 0.0 }
 0x11d   : > { %v842_v41 = vpop.f32.mrf.mxu0  ;;  %v970_v42 = vpop.f32.mrf.mxu1 }
 0x11e   : > { %v1816_v43 = vpack.c.bf16 %v1066_v39, %v1065_v37  ;;  %v1896_v44 = vpack.c.bf16 %v1098_v40, %v1097_v38  ;;  %v843_v47 = vadd.f32 %v2337_v15, %v842_v41  ;;  %v971_v48 = vadd.f32 %v2337_v15, %v970_v42 }
 0x11f   : > { %v844_v45 = vpop.f32.mrf.mxu0  ;;  %v972_v46 = vpop.f32.mrf.mxu1 }
 0x120   : > { %1956 = vst [vmem:[%s2347_s23 + $0x20] sm:$0xff] %v1816_v43   ;;  %1972 = vst [vmem:[%s2347_s23 + $0xa0] sm:$0xff] %v1896_v44   ;;  %v1067_v55 = vmax.f32 %v843_v47, 0.0  ;;  %v1099_v56 = vmax.f32 %v971_v48, 0.0 }
 0x121   : > { %v845_v49 = vpop.f32.mrf.mxu0  ;;  %v973_v50 = vpop.f32.mrf.mxu1 }
 0x122   : > { %v846_v51 = vadd.f32 %v2337_v15, %v845_v49  ;;  %v974_v52 = vadd.f32 %v2337_v15, %v973_v50 }
 0x123   : > { %v847_v53 = vpop.f32.mrf.mxu0  ;;  %v975_v54 = vpop.f32.mrf.mxu1 }
 0x124   : > { %v1068_v57 = vmax.f32 %v846_v51, 0.0  ;;  %v1100_v58 = vmax.f32 %v974_v52, 0.0 }
 0x125   : > { %v850_v59 = vpop.f32.mrf.mxu0  ;;  %v978_v60 = vpop.f32.mrf.mxu1 }
 0x126   : > { %v1821_v61 = vpack.c.bf16 %v1068_v57, %v1067_v55  ;;  %v1901_v62 = vpack.c.bf16 %v1100_v58, %v1099_v56  ;;  %v851_v1 = vadd.f32 %v2337_v15, %v850_v59  ;;  %v979_v2 = vadd.f32 %v2337_v15, %v978_v60 }
 0x127   : > { %v852_v63 = vpop.f32.mrf.mxu0  ;;  %v980_v0 = vpop.f32.mrf.mxu1 }
 0x128   : > { %1957 = vst [vmem:[%s2347_s23 + $0x28] sm:$0xff] %v1821_v61   ;;  %1973 = vst [vmem:[%s2347_s23 + $0xa8] sm:$0xff] %v1901_v62   ;;  %v1069_v9 = vmax.f32 %v851_v1, 0.0  ;;  %v1101_v10 = vmax.f32 %v979_v2, 0.0 }
 0x129   : > { %v853_v3 = vpop.f32.mrf.mxu0  ;;  %v981_v4 = vpop.f32.mrf.mxu1 }
 0x12a   : > { %v854_v5 = vadd.f32 %v2337_v15, %v853_v3  ;;  %v982_v6 = vadd.f32 %v2337_v15, %v981_v4 }
 0x12b   : > { %v855_v7 = vpop.f32.mrf.mxu0  ;;  %v983_v8 = vpop.f32.mrf.mxu1 }
 0x12c   : > { %v1070_v11 = vmax.f32 %v854_v5, 0.0  ;;  %v1102_v12 = vmax.f32 %v982_v6, 0.0 }
 0x12d   : > { %v858_v13 = vpop.f32.mrf.mxu0  ;;  %v986_v14 = vpop.f32.mrf.mxu1 }
 0x12e   : > { %v1826_v16 = vpack.c.bf16 %v1070_v11, %v1069_v9  ;;  %v1906_v17 = vpack.c.bf16 %v1102_v12, %v1101_v10  ;;  %v859_v20 = vadd.f32 %v2337_v15, %v858_v13  ;;  %v987_v21 = vadd.f32 %v2337_v15, %v986_v14 }
 0x12f   : > { %v860_v18 = vpop.f32.mrf.mxu0  ;;  %v988_v19 = vpop.f32.mrf.mxu1 }
 0x130   : > { %1958 = vst [vmem:[%s2347_s23 + $0x30] sm:$0xff] %v1826_v16   ;;  %1974 = vst [vmem:[%s2347_s23 + $0xb0] sm:$0xff] %v1906_v17   ;;  %v1071_v28 = vmax.f32 %v859_v20, 0.0  ;;  %v1103_v29 = vmax.f32 %v987_v21, 0.0 }
 0x131   : > { %v861_v22 = vpop.f32.mrf.mxu0  ;;  %v989_v23 = vpop.f32.mrf.mxu1 }
 0x132   : > { %v862_v24 = vadd.f32 %v2337_v15, %v861_v22  ;;  %v990_v25 = vadd.f32 %v2337_v15, %v989_v23 }
 0x133   : > { %v863_v26 = vpop.f32.mrf.mxu0  ;;  %v991_v27 = vpop.f32.mrf.mxu1 }
 0x134   : > { %v1072_v30 = vmax.f32 %v862_v24, 0.0  ;;  %v1104_v31 = vmax.f32 %v990_v25, 0.0 }
 0x135   : > { %v866_v32 = vpop.f32.mrf.mxu0  ;;  %v994_v33 = vpop.f32.mrf.mxu1 }
 0x136   : > { %v1831_v34 = vpack.c.bf16 %v1072_v30, %v1071_v28  ;;  %v1911_v35 = vpack.c.bf16 %v1104_v31, %v1103_v29  ;;  %v867_v38 = vadd.f32 %v2337_v15, %v866_v32  ;;  %v995_v39 = vadd.f32 %v2337_v15, %v994_v33 }
 0x137   : > { %v868_v36 = vpop.f32.mrf.mxu0  ;;  %v996_v37 = vpop.f32.mrf.mxu1 }
 0x138   : > { %1959 = vst [vmem:[%s2347_s23 + $0x38] sm:$0xff] %v1831_v34   ;;  %1975 = vst [vmem:[%s2347_s23 + $0xb8] sm:$0xff] %v1911_v35   ;;  %v1073_v46 = vmax.f32 %v867_v38, 0.0  ;;  %v1105_v47 = vmax.f32 %v995_v39, 0.0 }
 0x139   : > { %v869_v40 = vpop.f32.mrf.mxu0  ;;  %v997_v41 = vpop.f32.mrf.mxu1 }
 0x13a   : > { %v870_v42 = vadd.f32 %v2337_v15, %v869_v40  ;;  %v998_v43 = vadd.f32 %v2337_v15, %v997_v41 }
 0x13b   : > { %v871_v44 = vpop.f32.mrf.mxu0  ;;  %v999_v45 = vpop.f32.mrf.mxu1 }
 0x13c   : > { %v1074_v48 = vmax.f32 %v870_v42, 0.0  ;;  %v1106_v49 = vmax.f32 %v998_v43, 0.0 }
 0x13d   : > { %v874_v50 = vpop.f32.mrf.mxu0  ;;  %v1002_v51 = vpop.f32.mrf.mxu1 }
 0x13e   : > { %v1836_v52 = vpack.c.bf16 %v1074_v48, %v1073_v46  ;;  %v1916_v53 = vpack.c.bf16 %v1106_v49, %v1105_v47  ;;  %v875_v56 = vadd.f32 %v2337_v15, %v874_v50  ;;  %v1003_v57 = vadd.f32 %v2337_v15, %v1002_v51 }
 0x13f   : > { %v876_v54 = vpop.f32.mrf.mxu0  ;;  %v1004_v55 = vpop.f32.mrf.mxu1 }
 0x140   : > { %1960 = vst [vmem:[%s2347_s23 + $0x40] sm:$0xff] %v1836_v52   ;;  %1976 = vst [vmem:[%s2347_s23 + $0xc0] sm:$0xff] %v1916_v53   ;;  %v1075_v0 = vmax.f32 %v875_v56, 0.0  ;;  %v1107_v1 = vmax.f32 %v1003_v57, 0.0 }
 0x141   : > { %v877_v58 = vpop.f32.mrf.mxu0  ;;  %v1005_v59 = vpop.f32.mrf.mxu1 }
 0x142   : > { %v878_v60 = vadd.f32 %v2337_v15, %v877_v58  ;;  %v1006_v61 = vadd.f32 %v2337_v15, %v1005_v59 }
 0x143   : > { %v879_v62 = vpop.f32.mrf.mxu0  ;;  %v1007_v63 = vpop.f32.mrf.mxu1 }
 0x144   : > { %v1076_v2 = vmax.f32 %v878_v60, 0.0  ;;  %v1108_v3 = vmax.f32 %v1006_v61, 0.0 }
 0x145   : > { %v882_v4 = vpop.f32.mrf.mxu0  ;;  %v1010_v5 = vpop.f32.mrf.mxu1 }
 0x146   : > { %v1841_v6 = vpack.c.bf16 %v1076_v2, %v1075_v0  ;;  %v1921_v7 = vpack.c.bf16 %v1108_v3, %v1107_v1  ;;  %v883_v10 = vadd.f32 %v2337_v15, %v882_v4  ;;  %v1011_v11 = vadd.f32 %v2337_v15, %v1010_v5 }
 0x147   : > { %v884_v8 = vpop.f32.mrf.mxu0  ;;  %v1012_v9 = vpop.f32.mrf.mxu1 }
 0x148   : > { %1961 = vst [vmem:[%s2347_s23 + $0x48] sm:$0xff] %v1841_v6   ;;  %1977 = vst [vmem:[%s2347_s23 + $0xc8] sm:$0xff] %v1921_v7   ;;  %v1077_v19 = vmax.f32 %v883_v10, 0.0  ;;  %v1109_v20 = vmax.f32 %v1011_v11, 0.0 }
 0x149   : > { %v885_v12 = vpop.f32.mrf.mxu0  ;;  %v1013_v13 = vpop.f32.mrf.mxu1 }
 0x14a   : > { %v886_v14 = vadd.f32 %v2337_v15, %v885_v12  ;;  %v1014_v16 = vadd.f32 %v2337_v15, %v1013_v13 }
 0x14b   : > { %v887_v17 = vpop.f32.mrf.mxu0  ;;  %v1015_v18 = vpop.f32.mrf.mxu1 }
 0x14c   : > { %v1078_v21 = vmax.f32 %v886_v14, 0.0  ;;  %v1110_v22 = vmax.f32 %v1014_v16, 0.0 }
 0x14d   : > { %v890_v23 = vpop.f32.mrf.mxu0  ;;  %v1018_v24 = vpop.f32.mrf.mxu1 }
 0x14e   : > { %v1846_v25 = vpack.c.bf16 %v1078_v21, %v1077_v19  ;;  %v1926_v26 = vpack.c.bf16 %v1110_v22, %v1109_v20  ;;  %v891_v29 = vadd.f32 %v2337_v15, %v890_v23  ;;  %v1019_v30 = vadd.f32 %v2337_v15, %v1018_v24 }
 0x14f   : > { %v892_v27 = vpop.f32.mrf.mxu0  ;;  %v1020_v28 = vpop.f32.mrf.mxu1 }
 0x150   : > { %1962 = vst [vmem:[%s2347_s23 + $0x50] sm:$0xff] %v1846_v25   ;;  %1978 = vst [vmem:[%s2347_s23 + $0xd0] sm:$0xff] %v1926_v26   ;;  %v1079_v37 = vmax.f32 %v891_v29, 0.0  ;;  %v1111_v38 = vmax.f32 %v1019_v30, 0.0 }
 0x151   : > { %v893_v31 = vpop.f32.mrf.mxu0  ;;  %v1021_v32 = vpop.f32.mrf.mxu1 }
 0x152   : > { %v894_v33 = vadd.f32 %v2337_v15, %v893_v31  ;;  %v1022_v34 = vadd.f32 %v2337_v15, %v1021_v32 }
 0x153   : > { %v895_v35 = vpop.f32.mrf.mxu0  ;;  %v1023_v36 = vpop.f32.mrf.mxu1 }
 0x154   : > { %v1080_v39 = vmax.f32 %v894_v33, 0.0  ;;  %v1112_v40 = vmax.f32 %v1022_v34, 0.0 }
 0x155   : > { %v898_v41 = vpop.f32.mrf.mxu0  ;;  %v1026_v42 = vpop.f32.mrf.mxu1 }
 0x156   : > { %v1851_v43 = vpack.c.bf16 %v1080_v39, %v1079_v37  ;;  %v1931_v44 = vpack.c.bf16 %v1112_v40, %v1111_v38  ;;  %v899_v47 = vadd.f32 %v2337_v15, %v898_v41  ;;  %v1027_v48 = vadd.f32 %v2337_v15, %v1026_v42 }
 0x157   : > { %v900_v45 = vpop.f32.mrf.mxu0  ;;  %v1028_v46 = vpop.f32.mrf.mxu1 }
 0x158   : > { %1963 = vst [vmem:[%s2347_s23 + $0x58] sm:$0xff] %v1851_v43   ;;  %1979 = vst [vmem:[%s2347_s23 + $0xd8] sm:$0xff] %v1931_v44   ;;  %v1081_v55 = vmax.f32 %v899_v47, 0.0  ;;  %v1113_v56 = vmax.f32 %v1027_v48, 0.0 }
 0x159   : > { %v901_v49 = vpop.f32.mrf.mxu0  ;;  %v1029_v50 = vpop.f32.mrf.mxu1 }
 0x15a   : > { %v902_v51 = vadd.f32 %v2337_v15, %v901_v49  ;;  %v1030_v52 = vadd.f32 %v2337_v15, %v1029_v50 }
 0x15b   : > { %v903_v53 = vpop.f32.mrf.mxu0  ;;  %v1031_v54 = vpop.f32.mrf.mxu1 }
 0x15c   : > { %v1082_v57 = vmax.f32 %v902_v51, 0.0  ;;  %v1114_v58 = vmax.f32 %v1030_v52, 0.0 }
 0x15d   : > { %v906_v59 = vpop.f32.mrf.mxu0  ;;  %v1034_v60 = vpop.f32.mrf.mxu1 }
 0x15e   : > { %v1856_v61 = vpack.c.bf16 %v1082_v57, %v1081_v55  ;;  %v1936_v62 = vpack.c.bf16 %v1114_v58, %v1113_v56  ;;  %v907_v1 = vadd.f32 %v2337_v15, %v906_v59  ;;  %v1035_v2 = vadd.f32 %v2337_v15, %v1034_v60 }
 0x15f   : > { %v908_v63 = vpop.f32.mrf.mxu0  ;;  %v1036_v0 = vpop.f32.mrf.mxu1 }
 0x160   : > { %1964 = vst [vmem:[%s2347_s23 + $0x60] sm:$0xff] %v1856_v61   ;;  %1980 = vst [vmem:[%s2347_s23 + $0xe0] sm:$0xff] %v1936_v62   ;;  %v1083_v9 = vmax.f32 %v907_v1, 0.0  ;;  %v1115_v10 = vmax.f32 %v1035_v2, 0.0 }
 0x161   : > { %v909_v3 = vpop.f32.mrf.mxu0  ;;  %v1037_v4 = vpop.f32.mrf.mxu1 }
 0x162   : > { %v910_v5 = vadd.f32 %v2337_v15, %v909_v3  ;;  %v1038_v6 = vadd.f32 %v2337_v15, %v1037_v4 }
 0x163   : > { %v911_v7 = vpop.f32.mrf.mxu0  ;;  %v1039_v8 = vpop.f32.mrf.mxu1 }
 0x164   : > { %v1084_v11 = vmax.f32 %v910_v5, 0.0  ;;  %v1116_v12 = vmax.f32 %v1038_v6, 0.0 }
 0x165   : > { %v914_v13 = vpop.f32.mrf.mxu0  ;;  %v1042_v14 = vpop.f32.mrf.mxu1 }
 0x166   : > { %v1861_v16 = vpack.c.bf16 %v1084_v11, %v1083_v9  ;;  %v1941_v17 = vpack.c.bf16 %v1116_v12, %v1115_v10  ;;  %v915_v20 = vadd.f32 %v2337_v15, %v914_v13  ;;  %v1043_v21 = vadd.f32 %v2337_v15, %v1042_v14 }
 0x167   : > { %v916_v18 = vpop.f32.mrf.mxu0  ;;  %v1044_v19 = vpop.f32.mrf.mxu1 }
 0x168   : > { %1965 = vst [vmem:[%s2347_s23 + $0x68] sm:$0xff] %v1861_v16   ;;  %1981 = vst [vmem:[%s2347_s23 + $0xe8] sm:$0xff] %v1941_v17   ;;  %v1085_v28 = vmax.f32 %v915_v20, 0.0  ;;  %v1117_v29 = vmax.f32 %v1043_v21, 0.0 }
 0x169   : > { %v917_v22 = vpop.f32.mrf.mxu0  ;;  %v1045_v23 = vpop.f32.mrf.mxu1 }
 0x16a   : > { %v918_v24 = vadd.f32 %v2337_v15, %v917_v22  ;;  %v1046_v25 = vadd.f32 %v2337_v15, %v1045_v23 }
 0x16b   : > { %v919_v26 = vpop.f32.mrf.mxu0  ;;  %v1047_v27 = vpop.f32.mrf.mxu1 }
 0x16c   : > { %v1086_v30 = vmax.f32 %v918_v24, 0.0  ;;  %v1118_v31 = vmax.f32 %v1046_v25, 0.0 }
 0x16d   : > { %v922_v32 = vpop.f32.mrf.mxu0  ;;  %v1050_v33 = vpop.f32.mrf.mxu1 }
 0x16e   : > { %v1866_v34 = vpack.c.bf16 %v1086_v30, %v1085_v28  ;;  %v1946_v35 = vpack.c.bf16 %v1118_v31, %v1117_v29  ;;  %v923_v38 = vadd.f32 %v2337_v15, %v922_v32  ;;  %v1051_v39 = vadd.f32 %v2337_v15, %v1050_v33 }
 0x16f   : > { %v924_v36 = vpop.f32.mrf.mxu0  ;;  %v1052_v37 = vpop.f32.mrf.mxu1 }
 0x170   : > { %1966 = vst [vmem:[%s2347_s23 + $0x70] sm:$0xff] %v1866_v34   ;;  %1982 = vst [vmem:[%s2347_s23 + $0xf0] sm:$0xff] %v1946_v35   ;;  %v1087_v46 = vmax.f32 %v923_v38, 0.0  ;;  %v1119_v47 = vmax.f32 %v1051_v39, 0.0 }
 0x171   : > { %v925_v40 = vpop.f32.mrf.mxu0  ;;  %v1053_v41 = vpop.f32.mrf.mxu1 }
 0x172   : > { %v926_v42 = vadd.f32 %v2337_v15, %v925_v40  ;;  %v1054_v43 = vadd.f32 %v2337_v15, %v1053_v41 }
 0x173   : > { %v927_v44 = vpop.f32.mrf.mxu0  ;;  %v1055_v45 = vpop.f32.mrf.mxu1 }
 0x174   : > { %v1088_v48 = vmax.f32 %v926_v42, 0.0  ;;  %v1120_v49 = vmax.f32 %v1054_v43, 0.0 }
 0x176   : > { %v1871_v50 = vpack.c.bf16 %v1088_v48, %v1087_v46  ;;  %v1951_v51 = vpack.c.bf16 %v1120_v49, %v1119_v47 }
 0x178   : > { %1967 = vst [vmem:[%s2347_s23 + $0x78] sm:$0xff] %v1871_v50   ;;  %1983 = vst [vmem:[%s2347_s23 + $0xf8] sm:$0xff] %v1951_v51  }
 0x179 PF: > { %s13_s14 = sadd.s32 1, %s2158_s14   ;;  %s2454_s12 = smov %s2154_s13 }
 0x17a   : > { %p10_p5 = scmp.ge.s32.totalorder %s13_s14, 6   ;;  %s2455_s13 = smov %s2457_s15 }
 0x17c   :  { %12 = sbr.rel (!%p10_p5) target bundleno = 2 (0x2), region = 68 }

</bundles_post_ra>
